<compile_context>
chip_gen: v7x
topology: tpu7x:2x2x1
jax: 0.10.0
libtpu: 0.0.40
codegen_flags: <defaults>
</compile_context>

<pallas_src>
import functools

import jax
import jax.numpy as jnp
from jax import lax
from jax.experimental import pallas as pl
from jax.experimental.pallas import tpu as pltpu


# ---------------------------------------------------------------------------
# Pallas kernel: tiled  (x @ w_scalefolded) + bias [+ residual] -> ReLU
# ---------------------------------------------------------------------------
def _round_up(x, m):
    return (x + m - 1) // m * m


def _pick_divisor_tile(dim, candidates=(512, 384, 256, 128)):
    """Largest candidate tile that divides `dim` (dim is a multiple of 128)."""
    for t in candidates:
        if dim % t == 0:
            return t
    return dim


def _pick_m_tile(m):
    """Row tile: full (padded to 8) rows if small, else divisor-friendly <=512."""
    if m <= 512:
        return _round_up(m, 8)
    for t in (512, 448, 384, 320, 256, 192, 128):
        if m % t == 0:
            return t
    return 512


def _make_matmul_kernel(apply_relu, has_residual):
    def kernel(*refs):
        if has_residual:
            x_ref, w_ref, b_ref, res_ref, o_ref, acc_ref = refs
        else:
            x_ref, w_ref, b_ref, o_ref, acc_ref = refs

        k = pl.program_id(2)

        @pl.when(k == 0)
        def _init():
            acc_ref[...] = jnp.zeros_like(acc_ref)

        # bf16 x bf16 -> f32 accumulation on the MXU.
        acc_ref[...] += jnp.dot(x_ref[...], w_ref[...],
                                preferred_element_type=jnp.float32)

        @pl.when(k == pl.num_programs(2) - 1)
        def _finalize():
            y = acc_ref[...] + b_ref[...]
            if has_residual:
                y = y + res_ref[...].astype(jnp.float32)
            if apply_relu:
                y = jnp.maximum(y, 0.0)
            o_ref[...] = y.astype(o_ref.dtype)

    return kernel


def matmul_bias_act(x_parts, w_parts, bias, residual=None, apply_relu=True,
                    out_dtype=jnp.float32):
    """relu(sum_i(x_i @ w_i) + bias [+ residual]).

    `x_parts` / `w_parts` may be single arrays or tuples of arrays that are
    (virtually) concatenated along K -- they are placed directly into the
    padded bf16 operand buffers, so fusing e.g. the downsample branch into
    conv3 costs no extra HBM round trip.  `w_parts` must already have the
    folded BN scale multiplied in; `bias` is the summed folded BN bias.
    K, N are padded to multiples of 128 (lane-dense output), M to the row tile.
    """
    if not isinstance(x_parts, (list, tuple)):
        x_parts = (x_parts,)
        w_parts = (w_parts,)

    M = x_parts[0].shape[0]
    Ks = [xp.shape[1] for xp in x_parts]
    K = sum(Ks)
    N = w_parts[0].shape[1]
    for xp, wp in zip(x_parts, w_parts):
        assert xp.shape[0] == M and wp.shape == (xp.shape[1], N)

    Kp = _round_up(K, 128)
    Np = _round_up(N, 128)
    tm = _pick_m_tile(M)
    Mp = _round_up(M, tm)
    tk = _pick_divisor_tile(Kp)
    tn = _pick_divisor_tile(Np)

    xb = jnp.zeros((Mp, Kp), jnp.bfloat16)
    wb = jnp.zeros((Kp, Np), jnp.bfloat16)
    off = 0
    for xp, wp in zip(x_parts, w_parts):
        k_i = xp.shape[1]
        xb = xb.at[:M, off:off + k_i].set(xp.astype(jnp.bfloat16))
        wb = wb.at[off:off + k_i, :N].set(wp.astype(jnp.bfloat16))
        off += k_i
    bb = jnp.zeros((1, Np), jnp.float32).at[0, :N].set(bias.astype(jnp.float32))

    grid = (Mp // tm, Np // tn, Kp // tk)

    in_specs = [
        pl.BlockSpec((tm, tk), lambda i, j, k: (i, k)),   # activations
        pl.BlockSpec((tk, tn), lambda i, j, k: (k, j)),   # scale-folded weights
        pl.BlockSpec((1, tn), lambda i, j, k: (0, j)),    # folded BN bias
    ]
    args = [xb, wb, bb]
    out_bytes = Mp * Np * jnp.dtype(out_dtype).itemsize
    bytes_accessed = xb.size * 2 + wb.size * 2 + bb.size * 4 + out_bytes

    if residual is not None:
        resb = jnp.zeros((Mp, Np), jnp.float32).at[:M, :N].set(
            residual.astype(jnp.float32))
        in_specs.append(pl.BlockSpec((tm, tn), lambda i, j, k: (i, j)))
        args.append(resb)
        bytes_accessed += resb.size * 4

    kernel = _make_matmul_kernel(apply_relu, residual is not None)

    out = pl.pallas_call(
        kernel,
        out_shape=jax.ShapeDtypeStruct((Mp, Np), out_dtype),
        grid=grid,
        in_specs=in_specs,
        out_specs=pl.BlockSpec((tm, tn), lambda i, j, k: (i, j)),
        scratch_shapes=[pltpu.VMEM((tm, tn), jnp.float32)],
        compiler_params=pltpu.CompilerParams(
            dimension_semantics=("parallel", "parallel", "arbitrary"),
            vmem_limit_bytes=32 * 1024 * 1024),
        cost_estimate=pl.CostEstimate(
            flops=2 * Mp * Kp * Np,
            transcendentals=0,
            bytes_accessed=bytes_accessed),
    )(*args)

    return out[:M, :N]


# ---------------------------------------------------------------------------
# Glue: im2col for the 3x3 conv, BN folding, parameter init
# ---------------------------------------------------------------------------
def im2col_3x3(x_nhwc, stride):
    N, H, W, C = x_nhwc.shape
    xp = jnp.pad(x_nhwc, ((0, 0), (1, 1), (1, 1), (0, 0)))
    Ho = (H + 2 - 3) // stride + 1
    Wo = (W + 2 - 3) // stride + 1
    cols = []
    for kh in range(3):
        for kw in range(3):
            cols.append(
                xp[:, kh:kh + (Ho - 1) * stride + 1:stride,
                      kw:kw + (Wo - 1) * stride + 1:stride, :]
            )
    patches = jnp.stack(cols, axis=3)            # [N, Ho, Wo, 9, C]
    return patches.reshape(N * Ho * Wo, 9 * C), (N, Ho, Wo)


def bn_fold(gamma, beta, mean, var, eps=1e-5):
    scale = gamma / jnp.sqrt(var + eps)
    bias = beta - mean * scale
    return scale, bias


def init_params(key, inplanes, planes, with_downsample=False):
    expansion = 4
    ks = jax.random.split(key, 16)

    def conv_w(k, cout, cin, kh, kw):
        fan = cin * kh * kw
        return jax.random.normal(k, (cout, cin, kh, kw), jnp.float32) / jnp.sqrt(fan)

    def bn_p(k, c):
        k1, k2, k3, k4 = jax.random.split(k, 4)
        gamma = 1.0 + 0.1 * jax.random.normal(k1, (c,), jnp.float32)
        beta = 0.1 * jax.random.normal(k2, (c,), jnp.float32)
        mean = 0.1 * jax.random.normal(k3, (c,), jnp.float32)
        var = 1.0 + 0.1 * jax.random.uniform(k4, (c,), jnp.float32)
        return (gamma, beta, mean, var)

    params = {
        "w1": conv_w(ks[0], planes, inplanes, 1, 1),
        "bn1": bn_p(ks[1], planes),
        "w2": conv_w(ks[2], planes, planes, 3, 3),
        "bn2": bn_p(ks[3], planes),
        "w3": conv_w(ks[4], planes * expansion, planes, 1, 1),
        "bn3": bn_p(ks[5], planes * expansion),
    }
    if with_downsample:
        params["wd"] = conv_w(ks[6], planes * expansion, inplanes, 1, 1)
        params["bnd"] = bn_p(ks[7], planes * expansion)
    return params


# ---------------------------------------------------------------------------
# Bottleneck forward (Pallas) and pure-JAX reference
# ---------------------------------------------------------------------------
@functools.partial(jax.jit, static_argnames=("stride",))
def bottleneck_bfp_forward(x_nchw, params, stride=1):
    x = jnp.transpose(x_nchw, (0, 2, 3, 1))          # NCHW -> NHWC
    N, H, W, Cin = x.shape
    planes = params["w1"].shape[0]
    Cout = params["w3"].shape[0]

    # conv1 (1x1) + bn1 + relu  (BN scale folded into the weights)
    s1, b1 = bn_fold(*params["bn1"])
    w1 = params["w1"].reshape(planes, Cin).T * s1[None, :]       # [Cin, planes]
    out1 = matmul_bias_act(x.reshape(N * H * W, Cin), w1, b1,
                           out_dtype=jnp.bfloat16)
    out1 = out1.reshape(N, H, W, planes)

    # conv2 (3x3, stride, pad=1) + bn2 + relu
    patches, (_, Ho, Wo) = im2col_3x3(out1, stride)
    s2, b2 = bn_fold(*params["bn2"])
    w2m = jnp.transpose(params["w2"], (2, 3, 1, 0)).reshape(9 * planes, planes)
    w2m = w2m * s2[None, :]
    out2 = matmul_bias_act(patches, w2m, b2, out_dtype=jnp.bfloat16)

    # conv3 (1x1) + bn3 [+ downsample(x) or identity residual] + relu
    s3, b3 = bn_fold(*params["bn3"])
    w3 = params["w3"].reshape(Cout, planes).T * s3[None, :]      # [planes, Cout]

    if "wd" in params:
        # Fuse downsample (1x1 conv stride s + BN) into the conv3 matmul via
        # K-concatenation: relu([out2 | xs] @ [[w3],[wd]] + (b3 + bd)).
        sd, bd = bn_fold(*params["bnd"])
        wd = params["wd"].reshape(Cout, Cin).T * sd[None, :]     # [Cin, Cout]
        xs = x[:, ::stride, ::stride, :].reshape(N * Ho * Wo, Cin)
        out3 = matmul_bias_act((out2, xs), (w3, wd), b3 + bd,
                               out_dtype=jnp.float32)
    else:
        if stride != 1 or Cin != Cout:
            raise ValueError("identity residual requires stride==1 and Cin==Cout; "
                             "provide downsample params (wd/bnd) otherwise")
        residual = x.reshape(N * H * W, Cin)
        out3 = matmul_bias_act(out2, w3, b3, residual=residual,
                               out_dtype=jnp.float32)

    out3 = out3.reshape(N, Ho, Wo, Cout)
    return jnp.transpose(out3, (0, 3, 1, 2))         # NHWC -> NCHW


def bottleneck_reference(x_nchw, params, stride=1, eps=1e-5):
    x = jnp.transpose(x_nchw, (0, 2, 3, 1))

    def conv(a, w_oihw, s, p):
        w = jnp.transpose(w_oihw, (2, 3, 1, 0))      # OIHW -> HWIO
        return lax.conv_general_dilated(
            a, w, (s, s), [(p, p), (p, p)],
            dimension_numbers=("NHWC", "HWIO", "NHWC"))

    def bn(a, p):
        gamma, beta, mean, var = p
        return gamma * (a - mean) / jnp.sqrt(var + eps) + beta

    out = jax.nn.relu(bn(conv(x, params["w1"], 1, 0), params["bn1"]))
    out = jax.nn.relu(bn(conv(out, params["w2"], stride, 1), params["bn2"]))
    out = bn(conv(out, params["w3"], 1, 0), params["bn3"])
    if "wd" in params:
        residual = bn(conv(x, params["wd"], stride, 0), params["bnd"])
    else:
        residual = x
    out = jax.nn.relu(out + residual)
    return jnp.transpose(out, (0, 3, 1, 2))


if __name__ == "__main__":
    key = jax.random.PRNGKey(0)
    k1, k2, k3, k4, k5, k6 = jax.random.split(key, 6)

    # Case 1: stride=1, inplanes == planes*4  ->  identity residual.
    N, inplanes, planes, H, W = 2, 16, 4, 8, 8
    x_a = jax.random.normal(k1, (N, inplanes, H, W), jnp.float32)   # NCHW like PyTorch
    p_a = init_params(k2, inplanes, planes)
    y_a = jax.block_until_ready(bottleneck_bfp_forward(x_a, p_a, stride=1))
    r_a = bottleneck_reference(x_a, p_a, stride=1)
    assert y_a.shape == (N, planes * 4, H, W), y_a.shape
    assert jnp.allclose(y_a, r_a, rtol=5e-2, atol=1e-1), \
        float(jnp.max(jnp.abs(y_a - r_a)))

    # Case 2: stride=2 with a 1x1-conv + BN downsample branch (fused into conv3).
    inplanes2, planes2 = 8, 4
    x_b = jax.random.normal(k3, (N, inplanes2, H, W), jnp.float32)
    p_b = init_params(k4, inplanes2, planes2, with_downsample=True)
    y_b = jax.block_until_ready(bottleneck_bfp_forward(x_b, p_b, stride=2))
    r_b = bottleneck_reference(x_b, p_b, stride=2)
    assert y_b.shape == (N, planes2 * 4, H // 2, W // 2), y_b.shape
    assert jnp.allclose(y_b, r_b, rtol=5e-2, atol=1e-1), \
        float(jnp.max(jnp.abs(y_b - r_b)))

    # Case 3: larger spatial/channels so the grid has multiple M and K steps.
    inplanes3, planes3, H3, W3 = 64, 16, 24, 24
    x_c = jax.random.normal(k5, (N, inplanes3, H3, W3), jnp.float32)
    p_c = init_params(k6, inplanes3, planes3)
    y_c = jax.block_until_ready(bottleneck_bfp_forward(x_c, p_c, stride=1))
    r_c = bottleneck_reference(x_c, p_c, stride=1)
    assert y_c.shape == (N, planes3 * 4, H3, W3), y_c.shape
    assert jnp.allclose(y_c, r_c, rtol=5e-2, atol=1e-1), \
        float(jnp.max(jnp.abs(y_c - r_c)))

    print("KERNEL_OK")
</pallas_src>

<mosaic_0001>
module attributes {stable_mosaic.version = 11 : i64} {
  func.func @kernel(%arg0: i32, %arg1: i32, %arg2: i32, %arg3: memref<128x128xbf16, #tpu.memory_space<vmem>>, %arg4: memref<128x128xbf16, #tpu.memory_space<vmem>>, %arg5: memref<1x128xf32, #tpu.memory_space<vmem>>, %arg6: memref<128x128xbf16, #tpu.memory_space<vmem>>, %arg7: memref<128x128xf32, #tpu.memory_space<vmem>>) attributes {dimension_semantics = [#tpu.dimension_semantics<parallel>, #tpu.dimension_semantics<parallel>, #tpu.dimension_semantics<arbitrary>], iteration_bounds = array<i64: 1, 1, 1>, scalar_prefetch = 0 : i64, scratch_operands = 1 : i64, tpu.core_type = #tpu.core_type<tc>, window_params = [{transform_indices = @transform_0, window_bounds = array<i64: 128, 128>}, {transform_indices = @transform_1, window_bounds = array<i64: 128, 128>}, {transform_indices = @transform_2, window_bounds = array<i64: 1, 128>}, {transform_indices = @transform_3, window_bounds = array<i64: 128, 128>}]} {
    %c0_i32 = arith.constant 0 : i32
    %0 = arith.cmpi eq, %arg2, %c0_i32 : i32
    %1 = arith.extui %0 : i1 to i32
    %c0_i32_0 = arith.constant 0 : i32
    %2 = arith.cmpi ne, %1, %c0_i32_0 : i32
    scf.if %2 {
      %cst_10 = arith.constant 0.000000e+00 : f32
      %12 = vector.broadcast %cst_10 : f32 to vector<128x128xf32>
      %c0_11 = arith.constant 0 : index
      %c0_12 = arith.constant 0 : index
      %13 = vector.load %arg7[%c0_11, %c0_12] : memref<128x128xf32, #tpu.memory_space<vmem>>, vector<128x128xf32>
      tpu.vector_store %arg7[%c0_11, %c0_12], %12 {strides = array<i32>} : memref<128x128xf32, #tpu.memory_space<vmem>>, vector<128x128xf32>,
    } else {
    }
    %c0 = arith.constant 0 : index
    %c0_1 = arith.constant 0 : index
    %3 = vector.load %arg7[%c0, %c0_1] : memref<128x128xf32, #tpu.memory_space<vmem>>, vector<128x128xf32>
    %c0_2 = arith.constant 0 : index
    %c0_3 = arith.constant 0 : index
    %4 = vector.load %arg3[%c0_2, %c0_3] : memref<128x128xbf16, #tpu.memory_space<vmem>>, vector<128x128xbf16>
    %c0_4 = arith.constant 0 : index
    %c0_5 = arith.constant 0 : index
    %5 = vector.load %arg4[%c0_4, %c0_5] : memref<128x128xbf16, #tpu.memory_space<vmem>>, vector<128x128xbf16>
    %cst = arith.constant dense<0.000000e+00> : vector<128x128xf32>
    %6 = tpu.matmul %4, %5, %cst {dimension_numbers = #tpu.dot_dimension_numbers<[1], [0], [0], [1], [0, 0, 1, 1], [], []>} : vector<128x128xbf16>, vector<128x128xbf16>, vector<128x128xf32> -> vector<128x128xf32>
    %7 = arith.addf %3, %6 : vector<128x128xf32>
    %c0_6 = arith.constant 0 : index
    %c0_7 = arith.constant 0 : index
    %8 = vector.load %arg7[%c0_6, %c0_7] : memref<128x128xf32, #tpu.memory_space<vmem>>, vector<128x128xf32>
    tpu.vector_store %arg7[%c0_6, %c0_7], %7 {strides = array<i32>} : memref<128x128xf32, #tpu.memory_space<vmem>>, vector<128x128xf32>,
    %c0_i32_8 = arith.constant 0 : i32
    %9 = arith.cmpi eq, %arg2, %c0_i32_8 : i32
    %10 = arith.extui %9 : i1 to i32
    %c0_i32_9 = arith.constant 0 : i32
    %11 = arith.cmpi ne, %10, %c0_i32_9 : i32
    scf.if %11 {
      %c0_10 = arith.constant 0 : index
      %c0_11 = arith.constant 0 : index
      %12 = vector.load %arg7[%c0_10, %c0_11] : memref<128x128xf32, #tpu.memory_space<vmem>>, vector<128x128xf32>
      %c0_12 = arith.constant 0 : index
      %c0_13 = arith.constant 0 : index
      %13 = vector.load %arg5[%c0_12, %c0_13] : memref<1x128xf32, #tpu.memory_space<vmem>>, vector<1x128xf32>
      %14 = vector.broadcast %13 : vector<1x128xf32> to vector<128x128xf32>
      %15 = arith.addf %12, %14 : vector<128x128xf32>
      %cst_14 = arith.constant 0.000000e+00 : f32
      %16 = vector.broadcast %cst_14 : f32 to vector<128x128xf32>
      %17 = arith.maximumf %15, %16 : vector<128x128xf32>
      %18 = arith.truncf %17 : vector<128x128xf32> to vector<128x128xbf16>
      %c0_15 = arith.constant 0 : index
      %c0_16 = arith.constant 0 : index
      %19 = vector.load %arg6[%c0_15, %c0_16] : memref<128x128xbf16, #tpu.memory_space<vmem>>, vector<128x128xbf16>
      tpu.vector_store %arg6[%c0_15, %c0_16], %18 {strides = array<i32>} : memref<128x128xbf16, #tpu.memory_space<vmem>>, vector<128x128xbf16>,
    } else {
    }
    return
  }
  func.func @transform_0(%arg0: i32, %arg1: i32, %arg2: i32) -> (i32, i32) {
    %c0_i32 = arith.constant 0 : i32
    return %arg0, %arg2 : i32, i32
  }
  func.func @transform_1(%arg0: i32, %arg1: i32, %arg2: i32) -> (i32, i32) {
    %c0_i32 = arith.constant 0 : i32
    return %arg2, %arg1 : i32, i32
  }
  func.func @transform_2(%arg0: i32, %arg1: i32, %arg2: i32) -> (i32, i32) {
    %c0_i32 = arith.constant 0 : i32
    %c0_i32_0 = arith.constant 0 : i32
    return %c0_i32, %arg1 : i32, i32
  }
  func.func @transform_3(%arg0: i32, %arg1: i32, %arg2: i32) -> (i32, i32) {
    %c0_i32 = arith.constant 0 : i32
    return %arg0, %arg1 : i32, i32
  }
}

module attributes {stable_mosaic.version = 11 : i64} {
  func.func @kernel(%arg0: i32, %arg1: i32, %arg2: i32, %arg3: memref<128x128xbf16, #tpu.memory_space<vmem>>, %arg4: memref<128x128xbf16, #tpu.memory_space<vmem>>, %arg5: memref<1x128xf32, #tpu.memory_space<vmem>>, %arg6: memref<128x128xf32, #tpu.memory_space<vmem>>, %arg7: memref<128x128xf32, #tpu.memory_space<vmem>>, %arg8: memref<128x128xf32, #tpu.memory_space<vmem>>) attributes {dimension_semantics = [#tpu.dimension_semantics<parallel>, #tpu.dimension_semantics<parallel>, #tpu.dimension_semantics<arbitrary>], iteration_bounds = array<i64: 1, 1, 1>, scalar_prefetch = 0 : i64, scratch_operands = 1 : i64, tpu.core_type = #tpu.core_type<tc>, window_params = [{transform_indices = @transform_0, window_bounds = array<i64: 128, 128>}, {transform_indices = @transform_1, window_bounds = array<i64: 128, 128>}, {transform_indices = @transform_2, window_bounds = array<i64: 1, 128>}, {transform_indices = @transform_3, window_bounds = array<i64: 128, 128>}, {transform_indices = @transform_4, window_bounds = array<i64: 128, 128>}]} {
    %c0_i32 = arith.constant 0 : i32
    %0 = arith.cmpi eq, %arg2, %c0_i32 : i32
    %1 = arith.extui %0 : i1 to i32
    %c0_i32_0 = arith.constant 0 : i32
    %2 = arith.cmpi ne, %1, %c0_i32_0 : i32
    scf.if %2 {
      %cst_10 = arith.constant 0.000000e+00 : f32
      %12 = vector.broadcast %cst_10 : f32 to vector<128x128xf32>
      %c0_11 = arith.constant 0 : index
      %c0_12 = arith.constant 0 : index
      %13 = vector.load %arg8[%c0_11, %c0_12] : memref<128x128xf32, #tpu.memory_space<vmem>>, vector<128x128xf32>
      tpu.vector_store %arg8[%c0_11, %c0_12], %12 {strides = array<i32>} : memref<128x128xf32, #tpu.memory_space<vmem>>, vector<128x128xf32>,
    } else {
    }
    %c0 = arith.constant 0 : index
    %c0_1 = arith.constant 0 : index
    %3 = vector.load %arg8[%c0, %c0_1] : memref<128x128xf32, #tpu.memory_space<vmem>>, vector<128x128xf32>
    %c0_2 = arith.constant 0 : index
    %c0_3 = arith.constant 0 : index
    %4 = vector.load %arg3[%c0_2, %c0_3] : memref<128x128xbf16, #tpu.memory_space<vmem>>, vector<128x128xbf16>
    %c0_4 = arith.constant 0 : index
    %c0_5 = arith.constant 0 : index
    %5 = vector.load %arg4[%c0_4, %c0_5] : memref<128x128xbf16, #tpu.memory_space<vmem>>, vector<128x128xbf16>
    %cst = arith.constant dense<0.000000e+00> : vector<128x128xf32>
    %6 = tpu.matmul %4, %5, %cst {dimension_numbers = #tpu.dot_dimension_numbers<[1], [0], [0], [1], [0, 0, 1, 1], [], []>} : vector<128x128xbf16>, vector<128x128xbf16>, vector<128x128xf32> -> vector<128x128xf32>
    %7 = arith.addf %3, %6 : vector<128x128xf32>
    %c0_6 = arith.constant 0 : index
    %c0_7 = arith.constant 0 : index
    %8 = vector.load %arg8[%c0_6, %c0_7] : memref<128x128xf32, #tpu.memory_space<vmem>>, vector<128x128xf32>
    tpu.vector_store %arg8[%c0_6, %c0_7], %7 {strides = array<i32>} : memref<128x128xf32, #tpu.memory_space<vmem>>, vector<128x128xf32>,
    %c0_i32_8 = arith.constant 0 : i32
    %9 = arith.cmpi eq, %arg2, %c0_i32_8 : i32
    %10 = arith.extui %9 : i1 to i32
    %c0_i32_9 = arith.constant 0 : i32
    %11 = arith.cmpi ne, %10, %c0_i32_9 : i32
    scf.if %11 {
      %c0_10 = arith.constant 0 : index
      %c0_11 = arith.constant 0 : index
      %12 = vector.load %arg8[%c0_10, %c0_11] : memref<128x128xf32, #tpu.memory_space<vmem>>, vector<128x128xf32>
      %c0_12 = arith.constant 0 : index
      %c0_13 = arith.constant 0 : index
      %13 = vector.load %arg5[%c0_12, %c0_13] : memref<1x128xf32, #tpu.memory_space<vmem>>, vector<1x128xf32>
      %14 = vector.broadcast %13 : vector<1x128xf32> to vector<128x128xf32>
      %15 = arith.addf %12, %14 : vector<128x128xf32>
      %c0_14 = arith.constant 0 : index
      %c0_15 = arith.constant 0 : index
      %16 = vector.load %arg6[%c0_14, %c0_15] : memref<128x128xf32, #tpu.memory_space<vmem>>, vector<128x128xf32>
      %17 = arith.addf %15, %16 : vector<128x128xf32>
      %cst_16 = arith.constant 0.000000e+00 : f32
      %18 = vector.broadcast %cst_16 : f32 to vector<128x128xf32>
      %19 = arith.maximumf %17, %18 : vector<128x128xf32>
      %c0_17 = arith.constant 0 : index
      %c0_18 = arith.constant 0 : index
      %20 = vector.load %arg7[%c0_17, %c0_18] : memref<128x128xf32, #tpu.memory_space<vmem>>, vector<128x128xf32>
      tpu.vector_store %arg7[%c0_17, %c0_18], %19 {strides = array<i32>} : memref<128x128xf32, #tpu.memory_space<vmem>>, vector<128x128xf32>,
    } else {
    }
    return
  }
  func.func @transform_0(%arg0: i32, %arg1: i32, %arg2: i32) -> (i32, i32) {
    %c0_i32 = arith.constant 0 : i32
    return %arg0, %arg2 : i32, i32
  }
  func.func @transform_1(%arg0: i32, %arg1: i32, %arg2: i32) -> (i32, i32) {
    %c0_i32 = arith.constant 0 : i32
    return %arg2, %arg1 : i32, i32
  }
  func.func @transform_2(%arg0: i32, %arg1: i32, %arg2: i32) -> (i32, i32) {
    %c0_i32 = arith.constant 0 : i32
    %c0_i32_0 = arith.constant 0 : i32
    return %c0_i32, %arg1 : i32, i32
  }
  func.func @transform_3(%arg0: i32, %arg1: i32, %arg2: i32) -> (i32, i32) {
    %c0_i32 = arith.constant 0 : i32
    return %arg0, %arg1 : i32, i32
  }
  func.func @transform_4(%arg0: i32, %arg1: i32, %arg2: i32) -> (i32, i32) {
    %c0_i32 = arith.constant 0 : i32
    return %arg0, %arg1 : i32, i32
  }
}

</mosaic_0001>

<bundles_post_ra>
// kernel: bottleneck_bfp_forward.3
= control target key start
LH: loop header
LB: loop body
LE: loop exit
PB: predicated region body
PF: predicated region fallthrough
CT: control target
= control target key end

     0   :  { %s721_s1 = inlined_call_operand.vmem [shape: bf16[128,128], index: 1, kind: input, shape index: {}]   ;;  %s722_s0 = inlined_call_operand.vmem [shape: bf16[128,128], index: 0, kind: input, shape index: {}]   ;;  %s723_s2 = inlined_call_operand.vmem [shape: f32[1,128], index: 2, kind: input, shape index: {}]   ;;  %s724_s3 = inlined_call_operand.vmem [shape: bf16[128,128], index: 3, kind: output, shape index: {}]  }
   0x1   :  { %v610_v0 = vld [vmem:[%s721_s1] sm:$0xff]   ;;  %v611_v1 = vld [vmem:[%s721_s1 + $0x8] sm:$0xff]   ;;  %v612_v2 = vld [vmem:[%s721_s1 + $0x10] sm:$0xff]  }
   0x2   :  { %562 = vmatprep.subr.bf16.mxu0 %v610_v0  ;;  %594 = vmatprep.subr.bf16.mxu1 %v610_v0  ;;  %v613_v3 = vld [vmem:[%s721_s1 + $0x18] sm:$0xff]   ;;  %v618_v4 = vld [vmem:[%s722_s0] sm:$0xff]   ;;  %v615_v7 = vld [vmem:[%s721_s1 + $0x28] sm:$0xff]  }
   0x3   :  { %563 = vmatpush3.bf16.msra.mxu0 %v610_v0  ;;  %602 = vmatpush3.bf16.msra.mxu1 %v610_v0  ;;  %v619_v5 = vld [vmem:[%s722_s0 + $0x20] sm:$0xff]   ;;  %v616_v8 = vld [vmem:[%s721_s1 + $0x30] sm:$0xff]   ;;  %v617_v9 = vld [vmem:[%s721_s1 + $0x38] sm:$0xff]  }
   0x4   :  { %564 = vmatprep.subr.bf16.mxu0 %v611_v1  ;;  %595 = vmatprep.subr.bf16.mxu1 %v611_v1  ;;  %v614_v6 = vld [vmem:[%s721_s1 + $0x20] sm:$0xff]   ;;  %v620_v10 = vld [vmem:[%s722_s0 + $0x8] sm:$0xff]   ;;  %v622_v12 = vld [vmem:[%s722_s0 + $0x10] sm:$0xff]  }
   0x5   :  { %578 = vmatprep.mubr.bf16.mxu0 %v618_v4  ;;  %586 = vmatprep.mubr.bf16.mxu1 %v619_v5  ;;  %v621_v11 = vld [vmem:[%s722_s0 + $0x28] sm:$0xff]   ;;  %v623_v13 = vld [vmem:[%s722_s0 + $0x30] sm:$0xff]   ;;  %v624_v14 = vld [vmem:[%s722_s0 + $0x18] sm:$0xff]  }
   0x6   :  { %v625_v15 = vld [vmem:[%s722_s0 + $0x38] sm:$0xff]   ;;  %v466_v16 = vld [vmem:[%s723_s2] ss:$0 sm:$0xff] }
   0x7   :  { %565 = vmatpush3.bf16.msra.mxu0 %v611_v1  ;;  %603 = vmatpush3.bf16.msra.mxu1 %v611_v1 }
   0x8   :  { %566 = vmatprep.subr.bf16.mxu0 %v612_v2  ;;  %596 = vmatprep.subr.bf16.mxu1 %v612_v2 }
   0xb   :  { %567 = vmatpush3.bf16.msra.mxu0 %v612_v2  ;;  %604 = vmatpush3.bf16.msra.mxu1 %v612_v2 }
   0xc   :  { %568 = vmatprep.subr.bf16.mxu0 %v613_v3  ;;  %597 = vmatprep.subr.bf16.mxu1 %v613_v3 }
   0xf   :  { %569 = vmatpush3.bf16.msra.mxu0 %v613_v3  ;;  %605 = vmatpush3.bf16.msra.mxu1 %v613_v3 }
  0x10   :  { %570 = vmatprep.subr.bf16.mxu0 %v614_v6  ;;  %598 = vmatprep.subr.bf16.mxu1 %v614_v6 }
  0x13   :  { %571 = vmatpush3.bf16.msra.mxu0 %v614_v6  ;;  %606 = vmatpush3.bf16.msra.mxu1 %v614_v6 }
  0x14   :  { %572 = vmatprep.subr.bf16.mxu0 %v615_v7  ;;  %599 = vmatprep.subr.bf16.mxu1 %v615_v7 }
  0x17   :  { %573 = vmatpush3.bf16.msra.mxu0 %v615_v7  ;;  %607 = vmatpush3.bf16.msra.mxu1 %v615_v7 }
  0x18   :  { %574 = vmatprep.subr.bf16.mxu0 %v616_v8  ;;  %600 = vmatprep.subr.bf16.mxu1 %v616_v8 }
  0x1b   :  { %575 = vmatpush3.bf16.msra.mxu0 %v616_v8  ;;  %608 = vmatpush3.bf16.msra.mxu1 %v616_v8 }
  0x1c   :  { %576 = vmatprep.subr.bf16.mxu0 %v617_v9  ;;  %601 = vmatprep.subr.bf16.mxu1 %v617_v9 }
  0x1f   :  { %577 = vmatpush3.bf16.msra.mxu0 %v617_v9  ;;  %609 = vmatpush3.bf16.msra.mxu1 %v617_v9 }
  0x22   :  { %579 = vmatmul.mubr.bf16.vlgmr.msra.gmra.mrb[0].mxu0 %v620_v10  ;;  %587 = vmatmul.mubr.bf16.vlgmr.msra.gmra.mrb[0].mxu1 %v621_v11 }
  0x23   :  { %582 = vmatprep.mubr.bf16.mxu0 %v622_v12  ;;  %590 = vmatprep.mubr.bf16.mxu1 %v623_v13 }
  0x2a   :  { %583 = vmatmul.mubr.bf16.gmra.mrb[4].mxu0 %v624_v14  ;;  %591 = vmatmul.mubr.bf16.gmra.mrb[4].mxu1 %v625_v15 }
  0xf5   :  { %v580_v17 = vpop.f32.mrb[0].mxu0  ;;  %v588_v18 = vpop.f32.mrb[0].mxu1 }
  0xf6   :  { %v336_v19 = vadd.f32 %v580_v17, %v466_v16  ;;  %v344_v20 = vadd.f32 %v588_v18, %v466_v16  ;;  %v213_v21 = vpop.f32.mrb[1].mxu0  ;;  %v245_v22 = vpop.f32.mrb[1].mxu1 }
  0xf7   :  { %v334_v23 = vadd.f32 %v466_v16, %v213_v21  ;;  %v342_v24 = vadd.f32 %v466_v16, %v245_v22  ;;  %v581_v25 = vpop.f32.mrb[2].mxu0  ;;  %v589_v26 = vpop.f32.mrb[2].mxu1 }
  0xf8   :  { %v337_v27 = vadd.f32 %v581_v25, %v466_v16  ;;  %v345_v28 = vadd.f32 %v589_v26, %v466_v16  ;;  %v216_v29 = vpop.f32.mrb[3].mxu0  ;;  %v248_v30 = vpop.f32.mrb[3].mxu1  ;;  %v352_v33 = vmax.f32 %v336_v19, 0.0  ;;  %v360_v34 = vmax.f32 %v344_v20, 0.0 }
  0xf9   :  { %v335_v31 = vadd.f32 %v466_v16, %v216_v29  ;;  %v343_v32 = vadd.f32 %v466_v16, %v248_v30  ;;  %v350_v37 = vmax.f32 %v334_v23, 0.0  ;;  %v358_v38 = vmax.f32 %v342_v24, 0.0 }
  0xfa   :  { %v353_v35 = vmax.f32 %v337_v27, 0.0  ;;  %v361_v36 = vmax.f32 %v345_v28, 0.0 }
  0xfb   :  { %v351_v39 = vmax.f32 %v335_v31, 0.0  ;;  %v359_v40 = vmax.f32 %v343_v32, 0.0 }
  0xfc   :  { %v507_v41 = vpack.c.bf16 %v353_v35, %v352_v33  ;;  %v527_v42 = vpack.c.bf16 %v361_v36, %v360_v34 }
  0xfd   :  { %v502_v43 = vpack.c.bf16 %v351_v39, %v350_v37  ;;  %v522_v44 = vpack.c.bf16 %v359_v40, %v358_v38  ;;  %v584_v45 = vpop.f32.mrb[4].mxu0  ;;  %v592_v46 = vpop.f32.mrb[4].mxu1 }
  0xfe   :  { %539 = vst [vmem:[%s724_s3 + $0x8] sm:$0xff] %v507_v41   ;;  %543 = vst [vmem:[%s724_s3 + $0x28] sm:$0xff] %v527_v42   ;;  %v340_v47 = vadd.f32 %v584_v45, %v466_v16  ;;  %v348_v48 = vadd.f32 %v592_v46, %v466_v16  ;;  %v229_v49 = vpop.f32.mrb[5].mxu0  ;;  %v261_v50 = vpop.f32.mrb[5].mxu1 }
  0xff   :  { %503 = vst [vmem:[%s724_s3] sm:$0xff] %v502_v43   ;;  %542 = vst [vmem:[%s724_s3 + $0x20] sm:$0xff] %v522_v44   ;;  %v338_v51 = vadd.f32 %v466_v16, %v229_v49  ;;  %v346_v52 = vadd.f32 %v466_v16, %v261_v50  ;;  %v585_v53 = vpop.f32.mrb[6].mxu0  ;;  %v593_v54 = vpop.f32.mrb[6].mxu1 }
 0x100   :  { %v341_v55 = vadd.f32 %v585_v53, %v466_v16  ;;  %v349_v56 = vadd.f32 %v593_v54, %v466_v16  ;;  %v232_v57 = vpop.f32.mrb[7].mxu0  ;;  %v264_v58 = vpop.f32.mrb[7].mxu1  ;;  %v356_v61 = vmax.f32 %v340_v47, 0.0  ;;  %v364_v62 = vmax.f32 %v348_v48, 0.0 }
 0x101   :  { %v339_v59 = vadd.f32 %v466_v16, %v232_v57  ;;  %v347_v60 = vadd.f32 %v466_v16, %v264_v58  ;;  %v354_v1 = vmax.f32 %v338_v51, 0.0  ;;  %v362_v2 = vmax.f32 %v346_v52, 0.0 }
 0x102   :  { %v357_v63 = vmax.f32 %v341_v55, 0.0  ;;  %v365_v0 = vmax.f32 %v349_v56, 0.0 }
 0x103   :  { %v355_v3 = vmax.f32 %v339_v59, 0.0  ;;  %v363_v4 = vmax.f32 %v347_v60, 0.0 }
 0x104   :  { %v517_v5 = vpack.c.bf16 %v357_v63, %v356_v61  ;;  %v537_v6 = vpack.c.bf16 %v365_v0, %v364_v62 }
 0x105   :  { %v512_v7 = vpack.c.bf16 %v355_v3, %v354_v1  ;;  %v532_v8 = vpack.c.bf16 %v363_v4, %v362_v2 }
 0x106   :  { %541 = vst [vmem:[%s724_s3 + $0x18] sm:$0xff] %v517_v5   ;;  %545 = vst [vmem:[%s724_s3 + $0x38] sm:$0xff] %v537_v6  }
 0x107   :  { %540 = vst [vmem:[%s724_s3 + $0x10] sm:$0xff] %v512_v7   ;;  %544 = vst [vmem:[%s724_s3 + $0x30] sm:$0xff] %v532_v8  }

// kernel: bottleneck_bfp_forward.5
= control target key start
LH: loop header
LB: loop body
LE: loop exit
PB: predicated region body
PF: predicated region fallthrough
CT: control target
= control target key end

     0   :  { %s715_s0 = inlined_call_operand.vmem [shape: bf16[128,128], index: 0, kind: input, shape index: {}]   ;;  %s716_s1 = inlined_call_operand.vmem [shape: bf16[128,128], index: 1, kind: input, shape index: {}]   ;;  %s717_s2 = inlined_call_operand.vmem [shape: f32[1,128], index: 2, kind: input, shape index: {}]   ;;  %s718_s3 = inlined_call_operand.vmem [shape: f32[128,128], index: 3, kind: input, shape index: {}]   ;;  %s719_s4 = inlined_call_operand.hbm [shape: f32[128,128], index: 4, kind: output, shape index: {}]  }
   0x1   :  { %v518_v0 = vld [vmem:[%s716_s1] sm:$0xff]   ;;  %v519_v1 = vld [vmem:[%s716_s1 + $0x8] sm:$0xff]   ;;  %v520_v2 = vld [vmem:[%s716_s1 + $0x10] sm:$0xff]  }
   0x2   :  { %467 = vmatprep.subr.bf16.mxu0 %v518_v0  ;;  %499 = vmatprep.subr.bf16.mxu1 %v518_v0  ;;  %v521_v3 = vld [vmem:[%s716_s1 + $0x18] sm:$0xff]   ;;  %v526_v4 = vld [vmem:[%s715_s0] sm:$0xff]   ;;  %v523_v7 = vld [vmem:[%s716_s1 + $0x28] sm:$0xff]  }
   0x3   :  { %468 = vmatpush3.bf16.msra.mxu0 %v518_v0  ;;  %507 = vmatpush3.bf16.msra.mxu1 %v518_v0  ;;  %v527_v5 = vld [vmem:[%s715_s0 + $0x20] sm:$0xff]  }
   0x4   :  { %469 = vmatprep.subr.bf16.mxu0 %v519_v1  ;;  %500 = vmatprep.subr.bf16.mxu1 %v519_v1  ;;  %v522_v6 = vld [vmem:[%s716_s1 + $0x20] sm:$0xff]  }
   0x5   :  { %483 = vmatprep.mubr.bf16.mxu0 %v526_v4  ;;  %491 = vmatprep.mubr.bf16.mxu1 %v527_v5 }
   0x7   :  { %470 = vmatpush3.bf16.msra.mxu0 %v519_v1  ;;  %508 = vmatpush3.bf16.msra.mxu1 %v519_v1 }
   0x8   :  { %471 = vmatprep.subr.bf16.mxu0 %v520_v2  ;;  %501 = vmatprep.subr.bf16.mxu1 %v520_v2 }
   0xb   :  { %472 = vmatpush3.bf16.msra.mxu0 %v520_v2  ;;  %509 = vmatpush3.bf16.msra.mxu1 %v520_v2 }
   0xc   :  { %473 = vmatprep.subr.bf16.mxu0 %v521_v3  ;;  %502 = vmatprep.subr.bf16.mxu1 %v521_v3 }
   0xf   :  { %474 = vmatpush3.bf16.msra.mxu0 %v521_v3  ;;  %510 = vmatpush3.bf16.msra.mxu1 %v521_v3 }
  0x10   :  { %475 = vmatprep.subr.bf16.mxu0 %v522_v6  ;;  %503 = vmatprep.subr.bf16.mxu1 %v522_v6 }
  0x11   :  { %9 = vsyncpa [#allocation4], 0  ;;  %v524_v8 = vld [vmem:[%s716_s1 + $0x30] sm:$0xff]   ;;  %v525_v9 = vld [vmem:[%s716_s1 + $0x38] sm:$0xff]   ;;  %s558_s25 = smov [#allocation3]  }
  0x12   :  { %v528_v10 = vld [vmem:[%s715_s0 + $0x8] sm:$0xff]   ;;  %v530_v12 = vld [vmem:[%s715_s0 + $0x10] sm:$0xff]   ;;  %v532_v14 = vld [vmem:[%s715_s0 + $0x18] sm:$0xff]  }
  0x13   :  { %476 = vmatpush3.bf16.msra.mxu0 %v522_v6  ;;  %511 = vmatpush3.bf16.msra.mxu1 %v522_v6  ;;  %v529_v11 = vld [vmem:[%s715_s0 + $0x28] sm:$0xff]   ;;  %v531_v13 = vld [vmem:[%s715_s0 + $0x30] sm:$0xff]   ;;  %v533_v15 = vld [vmem:[%s715_s0 + $0x38] sm:$0xff]   ;;  %s423_s0 = sshll.u32 %s558_s25, 4  ;;  %s424_s0 = int_to_ptr.vmem [resolvable:$true] %s423_s0 }
  0x14   :  { %477 = vmatprep.subr.bf16.mxu0 %v523_v7  ;;  %504 = vmatprep.subr.bf16.mxu1 %v523_v7  ;;  %v637_v16 = vld [vmem:[%s717_s2] ss:$0 sm:$0xff]  ;;  %v356_v18 = vld [vmem:[%s718_s3 + $0x10] sm:$0xff]  ;;  %v357_v30 = vld [vmem:[%s718_s3 + $0x18] sm:$0xff]  ;;  %p539_p1 = scmp.lt.s32.totalorder %s424_s0, %s424_s0 }
  0x15   :  { %v364_v20 = vld [vmem:[%s718_s3 + $0x50] sm:$0xff]  ;;  %v354_v24 = vld [vmem:[%s718_s3] sm:$0xff]  ;;  %v365_v32 = vld [vmem:[%s718_s3 + $0x58] sm:$0xff] }
  0x16   :  { %v362_v26 = vld [vmem:[%s718_s3 + $0x40] sm:$0xff]  ;;  %v355_v38 = vld [vmem:[%s718_s3 + $0x8] sm:$0xff]  ;;  %v360_v58 = vld [vmem:[%s718_s3 + $0x30] sm:$0xff] }
  0x17   :  { %478 = vmatpush3.bf16.msra.mxu0 %v523_v7  ;;  %512 = vmatpush3.bf16.msra.mxu1 %v523_v7  ;;  %v363_v40 = vld [vmem:[%s718_s3 + $0x48] sm:$0xff]  ;;  %v368_v60 = vld [vmem:[%s718_s3 + $0x70] sm:$0xff]  ;;  %v358_v0 = vld [vmem:[%s718_s3 + $0x20] sm:$0xff] }
  0x18   :  { %479 = vmatprep.subr.bf16.mxu0 %v524_v8  ;;  %505 = vmatprep.subr.bf16.mxu1 %v524_v8  ;;  %v366_v2 = vld [vmem:[%s718_s3 + $0x60] sm:$0xff]  ;;  %v361_v6 = vld [vmem:[%s718_s3 + $0x38] sm:$0xff] }
  0x1b   :  { %480 = vmatpush3.bf16.msra.mxu0 %v524_v8  ;;  %513 = vmatpush3.bf16.msra.mxu1 %v524_v8  ;;  %v369_v8 = vld [vmem:[%s718_s3 + $0x78] sm:$0xff] }
  0x1c   :  { %481 = vmatprep.subr.bf16.mxu0 %v525_v9  ;;  %506 = vmatprep.subr.bf16.mxu1 %v525_v9 }
  0x1f   :  { %482 = vmatpush3.bf16.msra.mxu0 %v525_v9  ;;  %514 = vmatpush3.bf16.msra.mxu1 %v525_v9 }
  0x22   :  { %484 = vmatmul.mubr.bf16.vlgmr.msra.gmra.mrb[0].mxu0 %v528_v10  ;;  %492 = vmatmul.mubr.bf16.vlgmr.msra.gmra.mrb[0].mxu1 %v529_v11 }
  0x23   :  { %487 = vmatprep.mubr.bf16.mxu0 %v530_v12  ;;  %495 = vmatprep.mubr.bf16.mxu1 %v531_v13 }
  0x2a   :  { %488 = vmatmul.mubr.bf16.gmra.mrb[4].mxu0 %v532_v14  ;;  %496 = vmatmul.mubr.bf16.gmra.mrb[4].mxu1 %v533_v15  ;;  %v359_v14 = vld [vmem:[%s718_s3 + $0x28] sm:$0xff] }
  0xf5   :  { %v485_v17 = vpop.f32.mrb[0].mxu0  ;;  %v493_v19 = vpop.f32.mrb[0].mxu1 }
  0xf6   :  { %v340_v21 = vadd.f32 %v485_v17, %v637_v16  ;;  %v348_v22 = vadd.f32 %v493_v19, %v637_v16  ;;  %v217_v23 = vpop.f32.mrb[1].mxu0  ;;  %v249_v25 = vpop.f32.mrb[1].mxu1  ;;  %v367_v17 = vld [vmem:[%s718_s3 + $0x68] sm:$0xff]  ;;  %s534_s3 = scalar_lea.vmem %s424_s0, 2048 }
  0xf7   :  { %v338_v27 = vadd.f32 %v637_v16, %v217_v23  ;;  %v346_v28 = vadd.f32 %v637_v16, %v249_v25  ;;  %v486_v29 = vpop.f32.mrb[2].mxu0  ;;  %v494_v31 = vpop.f32.mrb[2].mxu1  ;;  %p535_p0 = scmp.ne.s32.totalorder %s424_s0, %s534_s3  ;;  %p540_p2 = scmp.lt.s32.totalorder %s534_s3, %s534_s3 }
  0xf8   :  { %v372_v33 = vadd.f32 %v356_v18, %v340_v21  ;;  %v380_v34 = vadd.f32 %v364_v20, %v348_v22  ;;  %v341_v35 = vadd.f32 %v486_v29, %v637_v16  ;;  %v349_v36 = vadd.f32 %v494_v31, %v637_v16  ;;  %v220_v37 = vpop.f32.mrb[3].mxu0  ;;  %v252_v39 = vpop.f32.mrb[3].mxu1 }
  0xf9   :  { %v370_v41 = vadd.f32 %v354_v24, %v338_v27  ;;  %v378_v42 = vadd.f32 %v362_v26, %v346_v28  ;;  %v339_v43 = vadd.f32 %v637_v16, %v220_v37  ;;  %v347_v44 = vadd.f32 %v637_v16, %v252_v39  ;;  %p541_p3 = por %p540_p2, %p539_p1 }
  0xfa   :  { %v388_v45 = vmax.f32 %v372_v33, 0.0  ;;  %v396_v46 = vmax.f32 %v380_v34, 0.0  ;;  %v373_v47 = vadd.f32 %v357_v30, %v341_v35  ;;  %v381_v48 = vadd.f32 %v365_v32, %v349_v36 }
  0xfb   :  { %v386_v49 = vmax.f32 %v370_v41, 0.0  ;;  %v394_v50 = vmax.f32 %v378_v42, 0.0  ;;  %v371_v51 = vadd.f32 %v355_v38, %v339_v43  ;;  %v379_v52 = vadd.f32 %v363_v40, %v347_v44  ;;  %p542_p4 = pnand %p541_p3, %p535_p0 }
  0xfc   :  { %404 = vst [vmem:[#allocation3 + $0x10] sm:$0xff] %v388_v45  ;;  %412 = vst [vmem:[#allocation3 + $0x50] sm:$0xff] %v396_v46  ;;  %v389_v53 = vmax.f32 %v373_v47, 0.0  ;;  %v397_v54 = vmax.f32 %v381_v48, 0.0 }
  0xfd   :  { %402 = vst [vmem:[#allocation3] sm:$0xff] %v386_v49  ;;  %410 = vst [vmem:[#allocation3 + $0x40] sm:$0xff] %v394_v50  ;;  %v387_v55 = vmax.f32 %v371_v51, 0.0  ;;  %v395_v56 = vmax.f32 %v379_v52, 0.0  ;;  %v489_v57 = vpop.f32.mrb[4].mxu0  ;;  %v497_v59 = vpop.f32.mrb[4].mxu1 }
  0xfe   :  { %405 = vst [vmem:[#allocation3 + $0x18] sm:$0xff] %v389_v53  ;;  %413 = vst [vmem:[#allocation3 + $0x58] sm:$0xff] %v397_v54  ;;  %v344_v61 = vadd.f32 %v489_v57, %v637_v16  ;;  %v352_v62 = vadd.f32 %v497_v59, %v637_v16  ;;  %v233_v63 = vpop.f32.mrb[5].mxu0  ;;  %v265_v1 = vpop.f32.mrb[5].mxu1 }
  0xff   :  { %403 = vst [vmem:[#allocation3 + $0x8] sm:$0xff] %v387_v55  ;;  %411 = vst [vmem:[#allocation3 + $0x48] sm:$0xff] %v395_v56  ;;  %v342_v3 = vadd.f32 %v637_v16, %v233_v63  ;;  %v350_v4 = vadd.f32 %v637_v16, %v265_v1  ;;  %v490_v5 = vpop.f32.mrb[6].mxu0  ;;  %v498_v7 = vpop.f32.mrb[6].mxu1 }
 0x100   :  { %v376_v9 = vadd.f32 %v360_v58, %v344_v61  ;;  %v384_v10 = vadd.f32 %v368_v60, %v352_v62  ;;  %v345_v11 = vadd.f32 %v490_v5, %v637_v16  ;;  %v353_v12 = vadd.f32 %v498_v7, %v637_v16  ;;  %v236_v13 = vpop.f32.mrb[7].mxu0  ;;  %v268_v15 = vpop.f32.mrb[7].mxu1 }
 0x101   :  { %v374_v18 = vadd.f32 %v358_v0, %v342_v3  ;;  %v382_v19 = vadd.f32 %v366_v2, %v350_v4  ;;  %v343_v20 = vadd.f32 %v637_v16, %v236_v13  ;;  %v351_v21 = vadd.f32 %v637_v16, %v268_v15 }
 0x102   :  { %v392_v22 = vmax.f32 %v376_v9, 0.0  ;;  %v400_v23 = vmax.f32 %v384_v10, 0.0  ;;  %v377_v24 = vadd.f32 %v361_v6, %v345_v11  ;;  %v385_v25 = vadd.f32 %v369_v8, %v353_v12 }
 0x103   :  { %v390_v26 = vmax.f32 %v374_v18, 0.0  ;;  %v398_v27 = vmax.f32 %v382_v19, 0.0  ;;  %v375_v28 = vadd.f32 %v359_v14, %v343_v20  ;;  %v383_v29 = vadd.f32 %v367_v17, %v351_v21 }
 0x104   :  { %408 = vst [vmem:[#allocation3 + $0x30] sm:$0xff] %v392_v22  ;;  %416 = vst [vmem:[#allocation3 + $0x70] sm:$0xff] %v400_v23  ;;  %v393_v30 = vmax.f32 %v377_v24, 0.0  ;;  %v401_v31 = vmax.f32 %v385_v25, 0.0 }
 0x105   :  { %406 = vst [vmem:[#allocation3 + $0x20] sm:$0xff] %v390_v26  ;;  %414 = vst [vmem:[#allocation3 + $0x60] sm:$0xff] %v398_v27  ;;  %v391_v32 = vmax.f32 %v375_v28, 0.0  ;;  %v399_v33 = vmax.f32 %v383_v29, 0.0 }
 0x106   :  { %409 = vst [vmem:[#allocation3 + $0x38] sm:$0xff] %v393_v30  ;;  %417 = vst [vmem:[#allocation3 + $0x78] sm:$0xff] %v401_v31 }
 0x107   :  { %407 = vst [vmem:[#allocation3 + $0x28] sm:$0xff] %v391_v32  ;;  %415 = vst [vmem:[#allocation3 + $0x68] sm:$0xff] %v399_v33 }
 0x108   :  { %545 = shalt.err (!%p542_p4)
}
 0x109   :  { %s546_s27 = scalar_lea.hbm %s719_s4, 2048 }
 0x10a   :  { %p547_p5 = scmp.ne.s32.totalorder %s719_s4, %s546_s27  ;;  %p550_p6 = scmp.lt.u32.totalorder %s546_s27, %s719_s4 }
 0x10c   :  { %p552_p7 = pnand %p550_p6, %p547_p5 }
 0x10e   :  { %555 = shalt.err (!%p552_p7)
}
 0x10f   :  { %s559_s6 = smov 128   ;;  %s560_s7 = smov 8  }
 0x110   :  { %429 = dma.vmem_to_hbm [thread:$0]  %s424_s0, 2048, %s719_s4, [#allocation4], %s559_s6, %s559_s6, %s560_s7  }
 0x111   :  { %556 = dma.done.wait [#allocation4], 2048  }
 0x112   :  { %557 = vsyncadd [#allocation4], 4294965248 }
 0x113   :  { %433 = vsyncpa [#allocation4], 1 }

</bundles_post_ra>
